<compile_context>
chip_gen: v7x
topology: tpu7x:2x2x1
jax: 0.10.0
libtpu: 0.0.40
codegen_flags: <defaults>
</compile_context>

<pallas_src>
import functools

import jax
import jax.numpy as jnp
from jax.experimental import pallas as pl
from jax.experimental.pallas import tpu as pltpu


def _conv_matmul_mxu_kernel(x_ref, w_ref, b_ref, o_ref):
    # x_ref: (1, K, tm)  w_ref: (C_out, K)  b_ref: (C_out, 1)
    # o_ref: (1, C_out, tm) -> lane-dense output.
    acc = jnp.dot(w_ref[...], x_ref[0], preferred_element_type=jnp.float32)
    o_ref[0] = (acc + b_ref[...]).astype(o_ref.dtype)


def _conv_matmul_vpu_kernel(x_ref, w_ref, b_ref, o_ref):
    # Tiny contraction (K, C_out small): avoid the MXU push cadence and do
    # K lane/sublane-broadcast multiply-adds on the VPU (free of the vext
    # slot, keeps the kernel HBM-bound).
    x = x_ref[0].astype(jnp.float32)      # (K, tm)
    w = w_ref[...].astype(jnp.float32)    # (C_out, K)
    b = b_ref[...]                        # (C_out, 1)
    k_dim = x.shape[0]
    acc = w[:, 0:1] * x[0:1, :]           # (C_out, tm)
    for k in range(1, k_dim):             # K is small & static (<= 15 here)
        acc = acc + w[:, k:k + 1] * x[k:k + 1, :]
    o_ref[0] = (acc + b).astype(o_ref.dtype)


def _round_up(x, m):
    return ((x + m - 1) // m) * m


def _pallas_conv_matmul(x3, w2, bias, out_dtype=None):
    """x3: (N, K, M), w2: (C_out, K), bias: (C_out,) -> (N, C_out, M)."""
    N, K, M = x3.shape
    C_out = w2.shape[0]
    out_dtype = out_dtype or x3.dtype

    # --- spatial (lane) tile size ------------------------------------------
    # HBM-bound kernel (~(K+C_out)*4 bytes per output column): make the tile
    # as big as the VMEM budget allows so per-step overhead and DMA row size
    # stop mattering. Budget covers double-buffered input + output blocks.
    bytes_per_col = (K + C_out) * 4 * 2                 # f32, dbl-buffered
    budget = 32 * 1024 * 1024                           # safe on v5e/v6e/v7x
    cap = max(128, min(131072, (budget // bytes_per_col) // 128 * 128))
    tm = min(cap, _round_up(M, 128))
    # Keep at least 2 grid steps so both v7x TensorCores get work.
    if N * pl.cdiv(M, tm) < 2 and tm > 128:
        tm = max(128, _round_up(tm // 2, 128))
    grid_m = pl.cdiv(M, tm)

    # Communicate the real footprint to the compiler (don't rely on the
    # per-generation scoped-VMEM defaults).
    vmem_bytes = bytes_per_col * tm + (C_out * (K + 1)) * 4 * 2 + (1 << 20)
    vmem_bytes = int(min(vmem_bytes, 100 * 1024 * 1024))

    # MXU only pays off once the contraction is non-trivial.
    use_vpu = K * ((C_out + 7) // 8) < 16
    kernel = _conv_matmul_vpu_kernel if use_vpu else _conv_matmul_mxu_kernel

    bias2d = bias.reshape(C_out, 1).astype(jnp.float32)

    return pl.pallas_call(
        kernel,
        out_shape=jax.ShapeDtypeStruct((N, C_out, M), out_dtype),
        grid_spec=pltpu.PrefetchScalarGridSpec(
            num_scalar_prefetch=0,
            grid=(N, grid_m),
            in_specs=[
                pl.BlockSpec((1, K, tm), lambda n, j: (n, 0, j)),
                pl.BlockSpec((C_out, K), lambda n, j: (0, 0)),
                pl.BlockSpec((C_out, 1), lambda n, j: (0, 0)),
            ],
            out_specs=pl.BlockSpec((1, C_out, tm), lambda n, j: (n, 0, j)),
        ),
        compiler_params=pltpu.CompilerParams(
            dimension_semantics=("parallel", "parallel"),
            vmem_limit_bytes=vmem_bytes),
    )(x3, w2, bias2d)


def classifier_block_forward(x, weight, bias, *, stride=1, out_dtype=None):
    """Equivalent of ClassifierBlock.forward.

    x      : (N, C_in, H, W)           float32, NCHW
    weight : (C_out, C_in, kh, kw)     float32  (PyTorch Conv2d OIHW layout)
    bias   : (C_out,)                  float32
    returns: (N, C_out, H_out, W_out)  NCHW (dtype = out_dtype or x.dtype)
    """
    N, C_in, H, W = x.shape
    C_out, _, kh, kw = weight.shape
    H_out = (H - kh) // stride + 1
    W_out = (W - kw) // stride + 1

    if kh == 1 and kw == 1 and stride == 1:
        # FastSurfer fast path: pure views, no im2col, no transposes.
        x3 = x.reshape(N, C_in, H * W)
        w2 = weight.reshape(C_out, C_in)
    else:
        # General fallback: im2col in (N, K, M) with K ordered C_in-major /
        # (kh, kw)-minor so it matches weight.reshape(C_out, C_in*kh*kw).
        # TODO(synk): fuse the kh*kw taps into the kernel (reduction grid
        # axis over taps reading strided windows of x) instead of
        # materializing the im2col intermediate in HBM.
        slices = []
        for di in range(kh):
            for dj in range(kw):
                slices.append(
                    x[:, :, di:di + stride * H_out:stride,
                           dj:dj + stride * W_out:stride])   # (N, C_in, H_out, W_out)
        p = jnp.stack(slices, axis=2)                         # (N, C_in, kh*kw, Ho, Wo)
        x3 = p.reshape(N, C_in * kh * kw, H_out * W_out)
        w2 = weight.reshape(C_out, C_in * kh * kw)

    out = _pallas_conv_matmul(x3, w2, bias, out_dtype)        # (N, C_out, Ho*Wo)
    return out.reshape(N, C_out, H_out, W_out)                # already NCHW


if __name__ == "__main__":
    # params = {num_channels: 4, num_classes: 8, kernel_c: 1, stride_conv: 1}
    key = jax.random.PRNGKey(0)
    k_x, k_w, k_b = jax.random.split(key, 3)

    N, C_in, H, W = 2, 4, 16, 16
    C_out, kh, kw, stride = 8, 1, 1, 1

    x = jax.random.normal(k_x, (N, C_in, H, W), dtype=jnp.float32)
    fan_in = C_in * kh * kw
    bound = 1.0 / (fan_in ** 0.5)
    weight = jax.random.uniform(k_w, (C_out, C_in, kh, kw),
                                minval=-bound, maxval=bound, dtype=jnp.float32)
    bias = jax.random.uniform(k_b, (C_out,),
                              minval=-bound, maxval=bound, dtype=jnp.float32)

    fwd = jax.jit(functools.partial(classifier_block_forward, stride=stride))
    logits = fwd(x, weight, bias)
    jax.block_until_ready(logits)

    ref = jax.lax.conv_general_dilated(
        x, weight, window_strides=(stride, stride), padding="VALID",
        dimension_numbers=("NCHW", "OIHW", "NCHW")) + bias.reshape(1, C_out, 1, 1)
    assert logits.shape == (N, C_out, H, W)
    assert jnp.allclose(logits, ref, atol=1e-5, rtol=1e-5)

    # Also exercise the general kernel/stride (im2col, MXU path, ragged M).
    kh2, kw2, stride2 = 3, 3, 2
    weight2 = jax.random.uniform(k_w, (C_out, C_in, kh2, kw2),
                                 minval=-bound, maxval=bound, dtype=jnp.float32)
    fwd2 = jax.jit(functools.partial(classifier_block_forward, stride=stride2))
    logits2 = fwd2(x, weight2, bias)
    jax.block_until_ready(logits2)
    ref2 = jax.lax.conv_general_dilated(
        x, weight2, window_strides=(stride2, stride2), padding="VALID",
        dimension_numbers=("NCHW", "OIHW", "NCHW")) + bias.reshape(1, C_out, 1, 1)
    assert logits2.shape == ref2.shape
    assert jnp.allclose(logits2, ref2, atol=1e-5, rtol=1e-5)

    print("KERNEL_OK")
</pallas_src>

<mosaic_0001>
module attributes {stable_mosaic.version = 11 : i64} {
  func.func @_conv_matmul_vpu_kernel(%arg0: i32, %arg1: i32, %arg2: memref<1x4x256xf32, #tpu.memory_space<vmem>>, %arg3: memref<8x4xf32, #tpu.memory_space<vmem>>, %arg4: memref<8x1xf32, #tpu.memory_space<vmem>>, %arg5: memref<1x8x256xf32, #tpu.memory_space<vmem>>) attributes {dimension_semantics = [#tpu.dimension_semantics<parallel>, #tpu.dimension_semantics<parallel>], iteration_bounds = array<i64: 2, 1>, scalar_prefetch = 0 : i64, scratch_operands = 0 : i64, tpu.core_type = #tpu.core_type<tc>, window_params = [{transform_indices = @transform_0, window_bounds = array<i64: 1, 4, 256>}, {pipeline_mode = #tpu.pipeline_mode<synchronous>, transform_indices = @transform_1, window_bounds = array<i64: 8, 4>}, {pipeline_mode = #tpu.pipeline_mode<synchronous>, transform_indices = @transform_2, window_bounds = array<i64: 8, 1>}, {transform_indices = @transform_3, window_bounds = array<i64: 1, 8, 256>}]} {
    %c0 = arith.constant 0 : index
    %c0_0 = arith.constant 0 : index
    %c0_1 = arith.constant 0 : index
    %0 = vector.load %arg2[%c0, %c0_0, %c0_1] : memref<1x4x256xf32, #tpu.memory_space<vmem>>, vector<1x4x256xf32>
    %1 = vector.shape_cast %0 : vector<1x4x256xf32> to vector<4x256xf32>
    %c0_2 = arith.constant 0 : index
    %c0_3 = arith.constant 0 : index
    %2 = vector.load %arg3[%c0_2, %c0_3] : memref<8x4xf32, #tpu.memory_space<vmem>>, vector<8x4xf32>
    %c0_4 = arith.constant 0 : index
    %c0_5 = arith.constant 0 : index
    %3 = vector.load %arg4[%c0_4, %c0_5] : memref<8x1xf32, #tpu.memory_space<vmem>>, vector<8x1xf32>
    %4 = vector.extract_strided_slice %2 {offsets = [0, 0], sizes = [8, 1], strides = [1, 1]} : vector<8x4xf32> to vector<8x1xf32>
    %5 = vector.extract_strided_slice %1 {offsets = [0, 0], sizes = [1, 256], strides = [1, 1]} : vector<4x256xf32> to vector<1x256xf32>
    %6 = vector.broadcast %4 : vector<8x1xf32> to vector<8x256xf32>
    %7 = vector.broadcast %5 : vector<1x256xf32> to vector<8x256xf32>
    %8 = arith.mulf %6, %7 : vector<8x256xf32>
    %9 = vector.extract_strided_slice %2 {offsets = [0, 1], sizes = [8, 1], strides = [1, 1]} : vector<8x4xf32> to vector<8x1xf32>
    %10 = vector.extract_strided_slice %1 {offsets = [1, 0], sizes = [1, 256], strides = [1, 1]} : vector<4x256xf32> to vector<1x256xf32>
    %11 = vector.broadcast %9 : vector<8x1xf32> to vector<8x256xf32>
    %12 = vector.broadcast %10 : vector<1x256xf32> to vector<8x256xf32>
    %13 = arith.mulf %11, %12 : vector<8x256xf32>
    %14 = arith.addf %8, %13 : vector<8x256xf32>
    %15 = vector.extract_strided_slice %2 {offsets = [0, 2], sizes = [8, 1], strides = [1, 1]} : vector<8x4xf32> to vector<8x1xf32>
    %16 = vector.extract_strided_slice %1 {offsets = [2, 0], sizes = [1, 256], strides = [1, 1]} : vector<4x256xf32> to vector<1x256xf32>
    %17 = vector.broadcast %15 : vector<8x1xf32> to vector<8x256xf32>
    %18 = vector.broadcast %16 : vector<1x256xf32> to vector<8x256xf32>
    %19 = arith.mulf %17, %18 : vector<8x256xf32>
    %20 = arith.addf %14, %19 : vector<8x256xf32>
    %21 = vector.extract_strided_slice %2 {offsets = [0, 3], sizes = [8, 1], strides = [1, 1]} : vector<8x4xf32> to vector<8x1xf32>
    %22 = vector.extract_strided_slice %1 {offsets = [3, 0], sizes = [1, 256], strides = [1, 1]} : vector<4x256xf32> to vector<1x256xf32>
    %23 = vector.broadcast %21 : vector<8x1xf32> to vector<8x256xf32>
    %24 = vector.broadcast %22 : vector<1x256xf32> to vector<8x256xf32>
    %25 = arith.mulf %23, %24 : vector<8x256xf32>
    %26 = arith.addf %20, %25 : vector<8x256xf32>
    %27 = vector.broadcast %3 : vector<8x1xf32> to vector<8x256xf32>
    %28 = arith.addf %26, %27 : vector<8x256xf32>
    %c0_6 = arith.constant 0 : index
    %c0_7 = arith.constant 0 : index
    %c0_8 = arith.constant 0 : index
    %29 = vector.load %arg5[%c0_6, %c0_7, %c0_8] : memref<1x8x256xf32, #tpu.memory_space<vmem>>, vector<1x8x256xf32>
    %30 = vector.shape_cast %29 : vector<1x8x256xf32> to vector<8x256xf32>
    %31 = vector.shape_cast %28 : vector<8x256xf32> to vector<1x8x256xf32>
    tpu.vector_store %arg5[%c0_6, %c0_7, %c0_8], %31 {strides = array<i32>} : memref<1x8x256xf32, #tpu.memory_space<vmem>>, vector<1x8x256xf32>,
    return
  }
  func.func @transform_0(%arg0: i32, %arg1: i32) -> (i32, i32, i32) {
    %c0_i32 = arith.constant 0 : i32
    %c0_i32_0 = arith.constant 0 : i32
    return %arg0, %c0_i32, %arg1 : i32, i32, i32
  }
  func.func @transform_1(%arg0: i32, %arg1: i32) -> (i32, i32) {
    %c0_i32 = arith.constant 0 : i32
    %c0_i32_0 = arith.constant 0 : i32
    %c0_i32_1 = arith.constant 0 : i32
    return %c0_i32, %c0_i32_0 : i32, i32
  }
  func.func @transform_2(%arg0: i32, %arg1: i32) -> (i32, i32) {
    %c0_i32 = arith.constant 0 : i32
    %c0_i32_0 = arith.constant 0 : i32
    %c0_i32_1 = arith.constant 0 : i32
    return %c0_i32, %c0_i32_0 : i32, i32
  }
  func.func @transform_3(%arg0: i32, %arg1: i32) -> (i32, i32, i32) {
    %c0_i32 = arith.constant 0 : i32
    %c0_i32_0 = arith.constant 0 : i32
    return %arg0, %c0_i32, %arg1 : i32, i32, i32
  }
}

</mosaic_0001>

<bundles_post_ra>
// kernel: classifier_block_forward.1
= control target key start
LH: loop header
LB: loop body
LE: loop exit
PB: predicated region body
PF: predicated region fallthrough
CT: control target
= control target key end

     0   :  { %s508_s12 = smov 0   ;;  %s510_s13 = smov 0   ;;  %s551_s0 = inlined_call_operand.vmem [shape: f32[2,4,256], index: 0, kind: input, shape index: {}]   ;;  %s552_s1 = inlined_call_operand.vmem [shape: f32[8,4], index: 1, kind: input, shape index: {}]   ;;  %s553_s2 = inlined_call_operand.vmem [shape: f32[8,1], index: 2, kind: input, shape index: {}]   ;;  %s554_s3 = inlined_call_operand.vmem [shape: f32[2,8,256], index: 3, kind: output, shape index: {}]  }
   0x1   :  { %s512_s14 = smov 0  }
   0x2 LB: > { %s25_s15 = sadd.s32 1, %s478_s13  ;;  %p417_p0 = scmp.ge.s32.totalorder %s482_s14, 1  ;;  %s482_s14 = sphi %s512_s14, %s13_s14   ;;  %s478_s13 = sphi %s510_s13, %s556_s13   ;;  %s474_s12 = sphi %s508_s12, %s555_s12  }
   0x3   : > { %p27_p1 = scmp.ge.s32.totalorder %s25_s15, 2  ;;  %p158_p2 = scmp.lt.s32.totalorder %s482_s14, 3 }
   0x5   : > { %s558_s15 = smov (%p27_p1, %s25_s15), 0  ;;  %p159_p3 = pnand %p417_p0, %p158_p2 }
   0x6   : > { %v211_v0 = vld [vmem:[%s552_s1] sm:$0xff] (!%p159_p3)  ;;  %v484_v1 = vmov (!%p159_p3), 0   ;;  %v485_v2 = vmov (!%p159_p3), 2   ;;  %v486_v3 = vmov (!%p159_p3), 1   ;;  %v487_v4 = vmov (!%p159_p3), 3   ;;  %p191_p4 = scmp.lt.s32.totalorder (!%p159_p3), %s474_s12, 1 }
   0x7   : > { %162 = sbr.rel (%p159_p3) target bundleno = 152 (0x98), region = 32  ;;  %454 = vset.pattern.permute.xlu0 (!%p159_p3), %v484_v1  ;;  %456 = vset.pattern.permute.xlu1 (!%p159_p3), %v485_v2  ;;  %v212_v5 = vld [vmem:[%s553_s2] sm:$0xff] (!%p159_p3)  ;;  %v219_v6 = vlaneseq (!%p159_p3) }
   0x8   : > { %215 = vperm.xlu0 (!%p159_p3), %454, %v211_v0   ;;  %266 = vperm.xlu1 (!%p159_p3), %456, %v211_v0  }
   0x9   : > { %v220_v7 = vshrl.u32 (!%p159_p3), %v219_v6, 7 }
   0xb   : > { %v221_v8 = vsub.s32 (!%p159_p3), 0, %v220_v7  ;;  %v225_v9 = vsub.s32 (!%p159_p3), 4, %v220_v7  ;;  %v245_v10 = vsub.s32 (!%p159_p3), 1, %v220_v7  ;;  %v249_v11 = vsub.s32 (!%p159_p3), 5, %v220_v7 }
   0xc   : > { %455 = vset.pattern.permute.xlu0 (!%p159_p3), %v486_v3  ;;  %457 = vset.pattern.permute.xlu1 (!%p159_p3), %v487_v4  ;;  %v271_v13 = vsub.s32 (!%p159_p3), 2, %v220_v7  ;;  %v275_v14 = vsub.s32 (!%p159_p3), 6, %v220_v7  ;;  %v297_v15 = vsub.s32 (!%p159_p3), 3, %v220_v7  ;;  %v301_v16 = vsub.s32 (!%p159_p3), 7, %v220_v7 }
   0xd   : > { %240 = vperm.xlu0 (!%p159_p3), %455, %v211_v0   ;;  %292 = vperm.xlu1 (!%p159_p3), %457, %v211_v0  }
   0xe   : > { %s560_s12 = smov (!%p191_p4, %s474_s12), 1 }
   0xf   : > { %s424_s20 = sshll.u32 %s560_s12, 3  ;;  %s425_s24 = sshll.u32 %s560_s12, 4 }
  0x10   : > { %s198_s23 = scalar_lea.vmem %s551_s0, %s424_s20  ;;  %s208_s27 = scalar_lea.vmem %s554_s3, %s425_s24 }
  0x11   : > { %458 = vset.pattern.permute.xlu1 %v484_v1  ;;  %459 = vset.pattern.permute.xlu0 %v484_v1  ;;  %v210_v12 = vld [vmem:[%s198_s23] sm:$0xff] }
  0x12   : > { %319 = vperm.xlu1 %458, %v212_v5   ;;  %v222_v17 = vrot.slane %v210_v12, %v221_v8  ;;  %v226_v18 = vrot.slane %v210_v12, %v225_v9  ;;  %v246_v19 = vrot.slane %v210_v12, %v245_v10  ;;  %v250_v20 = vrot.slane %v210_v12, %v249_v11 }
  0x13   : > { %v272_v21 = vrot.slane %v210_v12, %v271_v13  ;;  %v276_v22 = vrot.slane %v210_v12, %v275_v14  ;;  %v298_v25 = vrot.slane %v210_v12, %v297_v15  ;;  %v302_v26 = vrot.slane %v210_v12, %v301_v16 }
  0x14   : > { %v232_v27 = vrot.slane %v222_v17, %v221_v8  ;;  %v236_v28 = vrot.slane %v226_v18, %v221_v8  ;;  %v256_v29 = vrot.slane %v246_v19, %v245_v10  ;;  %v260_v30 = vrot.slane %v250_v20, %v245_v10 }
  0x15   : > { %v282_v31 = vrot.slane %v272_v21, %v271_v13  ;;  %v286_v32 = vrot.slane %v276_v22, %v271_v13  ;;  %v308_v33 = vrot.slane %v298_v25, %v297_v15  ;;  %v312_v34 = vrot.slane %v302_v26, %v297_v15 }
  0x87   : > { %v216_v23 = vpop.permute.xlu0 %215  ;;  %v267_v24 = vpop.permute.xlu1 %266 }
  0x88   : > { %v237_v37 = vmul.f32 %v232_v27, %v216_v23  ;;  %v238_v38 = vmul.f32 %v236_v28, %v216_v23  ;;  %v287_v41 = vmul.f32 %v282_v31, %v267_v24  ;;  %v288_v42 = vmul.f32 %v286_v32, %v267_v24 }
  0x8c   : > { %v241_v35 = vpop.permute.xlu0 %240  ;;  %v293_v36 = vpop.permute.xlu1 %292 }
  0x8d   : > { %v261_v39 = vmul.f32 %v256_v29, %v241_v35  ;;  %v262_v40 = vmul.f32 %v260_v30, %v241_v35  ;;  %v313_v45 = vmul.f32 %v308_v33, %v293_v36  ;;  %v314_v46 = vmul.f32 %v312_v34, %v293_v36 }
  0x8f   : > { %v263_v43 = vadd.f32 %v261_v39, %v237_v37  ;;  %v264_v44 = vadd.f32 %v262_v40, %v238_v38 }
  0x91   : > { %v289_v47 = vadd.f32 %v287_v41, %v263_v43  ;;  %v290_v48 = vadd.f32 %v288_v42, %v264_v44  ;;  %v320_v49 = vpop.permute.xlu1 %319 }
  0x93   : > { %v315_v50 = vadd.f32 %v313_v45, %v289_v47  ;;  %v316_v51 = vadd.f32 %v314_v46, %v290_v48 }
  0x95   : > { %v322_v52 = vadd.f32 %v320_v49, %v315_v50  ;;  %v323_v53 = vadd.f32 %v320_v49, %v316_v51 }
  0x97   : > { %324 = vst [vmem:[%s208_s27] sm:$0xff] %v322_v52  ;;  %325 = vst [vmem:[%s208_s27 + $0x8] sm:$0xff] %v323_v53 }
  0x98 PF: > { %s13_s14 = sadd.s32 1, %s482_s14   ;;  %s555_s12 = smov %s478_s13 }
  0x99   : > { %p10_p5 = scmp.ge.s32.totalorder %s13_s14, 4   ;;  %s556_s13 = smov %s558_s15 }
  0x9b   :  { %12 = sbr.rel (!%p10_p5) target bundleno = 2 (0x2), region = 62 }

</bundles_post_ra>
